<compile_context>
chip_gen: v7x
topology: tpu7x:2x2x1
jax: 0.10.0
libtpu: 0.0.40
codegen_flags: <defaults>
</compile_context>

<pallas_src>
import functools

import jax
import jax.numpy as jnp
from jax import lax
from jax.experimental import pallas as pl
from jax.experimental.pallas import tpu as pltpu


def _round_up(a: int, b: int) -> int:
    return ((a + b - 1) // b) * b


def _nerf_mlp_kernel(x_ref, w1_ref, b1_ref, w2_ref, b2_ref, o_ref, *, chunk, n_chunks):
    """One batch tile of out = ReLU(x @ W1 + b1) @ W2 + b2, in ~256-row sub-chunks."""
    b1 = b1_ref[...]            # (1, Dh) f32
    b2 = b2_ref[...]            # (1, Do) f32

    def body(c, carry):
        r0 = pl.multiple_of(c * chunk, chunk)
        rs = pl.ds(r0, chunk)
        # x arrives in its HBM dtype (f32); cast to the weight dtype (bf16) on the
        # VPU right before the MXU -> no separate XLA cast pass over x in HBM.
        xs = x_ref[rs, :].astype(w1_ref.dtype)
        h = jnp.dot(xs, w1_ref[...], preferred_element_type=jnp.float32)
        h = jnp.maximum(h + b1, 0.0)                      # bias + ReLU in f32 (VPU)
        out = jnp.dot(h.astype(w2_ref.dtype), w2_ref[...],
                      preferred_element_type=jnp.float32)
        o_ref[rs, :] = (out + b2).astype(o_ref.dtype)
        return carry

    # Sub-chunk loop keeps the hidden activation in vregs between the two matmuls
    # (no f32 + bf16 h round-trip through VMEM -> vector-store slot stays free).
    lax.fori_loop(0, n_chunks, body, None, unroll=True)


def nerf_mlp_prepare_params(w1, b1, w2, b2, *, compute_dtype=jnp.bfloat16, max_pack=8):
    """One-time parameter prep (hoisted out of the per-call forward).

    Pads the hidden dim, optionally builds block-diagonal "packed" weights so that
    P = 128 // input_dim consecutive rows of x map onto one lane-dense 128-lane row,
    and casts the weights to the MXU compute dtype.  Numerically exact rearrangement.
    """
    d_in, d_hid = w1.shape
    d_out = w2.shape[1]

    # Row-packing factor: P rows of x become one lane-dense packed row.
    p = 128 // d_in if (d_in <= 128 and 128 % d_in == 0) else 1
    p = min(p, max_pack)

    # Pad hidden dim so the packed hidden width (p * d_hid_p) is a multiple of 128.
    d_hid_p = _round_up(d_hid, max(8, 128 // p))

    w1p = jnp.zeros((d_in, d_hid_p), jnp.float32).at[:, :d_hid].set(w1.astype(jnp.float32))
    w2p = jnp.zeros((d_hid_p, d_out), jnp.float32).at[:d_hid, :].set(w2.astype(jnp.float32))
    b1p = jnp.zeros((d_hid_p,), jnp.float32).at[:d_hid].set(b1.astype(jnp.float32))
    b2p = b2.astype(jnp.float32)

    if p > 1:
        eye = jnp.eye(p, dtype=jnp.float32)
        w1p = jnp.kron(eye, w1p)          # (p*d_in,    p*d_hid_p) block-diagonal
        w2p = jnp.kron(eye, w2p)          # (p*d_hid_p, p*d_out)   block-diagonal
        b1p = jnp.tile(b1p, p)
        b2p = jnp.tile(b2p, p)

    return (w1p.astype(compute_dtype), b1p.reshape(1, -1),
            w2p.astype(compute_dtype), b2p.reshape(1, -1))


@functools.partial(jax.jit, static_argnames=("tile_n",))
def nerf_mlp_forward(x, w1p, b1p, w2p, b2p, *, tile_n=16384):
    """Fused NeRF MLP forward: ReLU(x @ W1 + b1) @ W2 + b2.

    Parameters must come from nerf_mlp_prepare_params.  x: (..., input_dim); tile_n is
    the target batch-tile size in original rows.
    """
    orig_shape = x.shape
    d_in = orig_shape[-1]
    x2 = x.reshape(-1, d_in)
    n = x2.shape[0]

    p = w1p.shape[0] // d_in          # row-packing factor (static, from prepped shapes)
    dh = w1p.shape[1]                 # packed (padded) hidden width
    do = w2p.shape[1]                 # packed output width = p * d_out
    d_out = do // p
    out_dtype = x.dtype

    # Pack p consecutive rows into one lane-dense row (free row-major reshape).
    n_pad = _round_up(n, p)
    if n_pad != n:                    # rare (n not a multiple of p); costs one pass
        x2 = jnp.pad(x2, ((0, n_pad - n), (0, 0)))
    rows = n_pad // p                 # packed row count
    xp = x2.reshape(rows, p * d_in)

    # --- batch tiling (in packed rows) --------------------------------------------
    chunk = max(8, 256 // p)                          # ~256 original rows / sub-chunk
    chunk = min(chunk, _round_up(rows, 8))
    tile_max = max(chunk, _round_up(max(tile_n // p, 1), chunk))
    steps = pl.cdiv(rows, tile_max)
    if steps == 1 and rows > 2 * chunk:
        steps = 2                                     # keep both v7x TensorCores busy
    tile = _round_up(pl.cdiv(rows, steps), chunk)

    # Shrink the tile if the double-buffered VMEM footprint would exceed a v7x-safe
    # budget (v7x has only 64 MiB physical VMEM; blocks are lane-padded to 128).
    def footprint(t):
        x_blk = t * _round_up(p * d_in, 128) * x2.dtype.itemsize
        o_blk = t * _round_up(do, 128) * jnp.dtype(out_dtype).itemsize
        w_blk = (w1p.size * w1p.dtype.itemsize + w2p.size * w2p.dtype.itemsize
                 + (b1p.size + b2p.size) * 4)
        return 2 * (x_blk + o_blk + w_blk)            # everything double-buffered

    budget = 40 * 1024 * 1024
    while footprint(tile) > budget and tile > chunk:
        tile = _round_up(tile // 2, chunk)

    grid = (pl.cdiv(rows, tile),)                     # ragged last block is masked
    n_chunks = tile // chunk

    kernel = functools.partial(_nerf_mlp_kernel, chunk=chunk, n_chunks=n_chunks)

    cost = pl.CostEstimate(
        flops=2 * grid[0] * tile * (p * d_in * dh + dh * do),
        transcendentals=0,
        bytes_accessed=(xp.size * xp.dtype.itemsize
                        + w1p.size * w1p.dtype.itemsize
                        + w2p.size * w2p.dtype.itemsize
                        + (b1p.size + b2p.size) * 4
                        + rows * do * jnp.dtype(out_dtype).itemsize),
    )

    out_p = pl.pallas_call(
        kernel,
        out_shape=jax.ShapeDtypeStruct((rows, do), out_dtype),
        grid_spec=pltpu.PrefetchScalarGridSpec(
            num_scalar_prefetch=0,
            grid=grid,
            in_specs=[
                # x: tiled over the (packed) batch axis, full feature (lane) axis.
                pl.BlockSpec((tile, p * d_in), lambda i: (i, 0)),
                # Parameters: full blocks, identical for every grid step.
                pl.BlockSpec(w1p.shape, lambda i: (0, 0)),
                pl.BlockSpec(b1p.shape, lambda i: (0, 0)),
                pl.BlockSpec(w2p.shape, lambda i: (0, 0)),
                pl.BlockSpec(b2p.shape, lambda i: (0, 0)),
            ],
            out_specs=pl.BlockSpec((tile, do), lambda i: (i, 0)),
        ),
        compiler_params=pltpu.CompilerParams(
            dimension_semantics=("parallel",),        # megacore sharding on v7x
            vmem_limit_bytes=48 * 1024 * 1024,        # < v7x 64 MiB physical VMEM
        ),
        cost_estimate=cost,
    )(xp, w1p, b1p, w2p, b2p)

    out = out_p.reshape(n_pad, d_out)[:n]             # unpack (free) + drop pad rows
    return out.reshape(*orig_shape[:-1], d_out)


# ----------------------------- reference & demo ------------------------------------

def init_params(key, input_dim, hidden_dim=64, output_dim=4):
    """PyTorch nn.Linear-style init: U[-1/sqrt(fan_in), +1/sqrt(fan_in)]."""
    k1, k2, k3, k4 = jax.random.split(key, 4)
    lim1 = 1.0 / (input_dim ** 0.5)
    lim2 = 1.0 / (hidden_dim ** 0.5)
    w1 = jax.random.uniform(k1, (input_dim, hidden_dim), jnp.float32, -lim1, lim1)
    b1 = jax.random.uniform(k2, (hidden_dim,), jnp.float32, -lim1, lim1)
    w2 = jax.random.uniform(k3, (hidden_dim, output_dim), jnp.float32, -lim2, lim2)
    b2 = jax.random.uniform(k4, (output_dim,), jnp.float32, -lim2, lim2)
    return w1, b1, w2, b2


def _reference(x, w1, b1, w2, b2):
    return jnp.maximum(x @ w1 + b1[None, :], 0.0) @ w2 + b2[None, :]


if __name__ == "__main__":
    key = jax.random.PRNGKey(0)
    k_x1, k_x2, k_x3, k_p1, k_p2 = jax.random.split(key, 5)

    # Model 1: input_dim=32 divides 128 -> packed path (P=4), default NeRF head dims.
    w1, b1, w2, b2 = init_params(k_p1, input_dim=32, hidden_dim=64, output_dim=4)
    params = nerf_mlp_prepare_params(w1, b1, w2, b2)

    x = jax.random.normal(k_x1, (1024, 32), jnp.float32)
    out = jax.block_until_ready(nerf_mlp_forward(x, *params))
    ref = _reference(x, w1, b1, w2, b2)
    assert out.shape == ref.shape
    assert jnp.allclose(out, ref, atol=2e-2, rtol=2e-2), "mismatch (packed path)"

    # Ragged batch (not a multiple of the tile) -> exercises masked boundary blocks.
    x_r = jax.random.normal(k_x2, (1000, 32), jnp.float32)
    out_r = jax.block_until_ready(nerf_mlp_forward(x_r, *params))
    ref_r = _reference(x_r, w1, b1, w2, b2)
    assert out_r.shape == ref_r.shape
    assert jnp.allclose(out_r, ref_r, atol=2e-2, rtol=2e-2), "mismatch (ragged batch)"

    # Model 2: input_dim=48 does not divide 128 -> plain (P=1) path, tiny batch.
    w1b, b1b, w2b, b2b = init_params(k_p2, input_dim=48, hidden_dim=64, output_dim=4)
    params_b = nerf_mlp_prepare_params(w1b, b1b, w2b, b2b)
    x_b = jax.random.normal(k_x3, (50, 48), jnp.float32)
    out_b = jax.block_until_ready(nerf_mlp_forward(x_b, *params_b))
    ref_b = _reference(x_b, w1b, b1b, w2b, b2b)
    assert out_b.shape == ref_b.shape
    assert jnp.allclose(out_b, ref_b, atol=2e-2, rtol=2e-2), "mismatch (P=1 path)"

    print("KERNEL_OK")
</pallas_src>

<mosaic_0001>
module attributes {stable_mosaic.version = 11 : i64} {
  func.func @_nerf_mlp_kernel(%arg0: i32, %arg1: memref<128x128xf32, #tpu.memory_space<vmem>>, %arg2: memref<128x256xbf16, #tpu.memory_space<vmem>>, %arg3: memref<1x256xf32, #tpu.memory_space<vmem>>, %arg4: memref<256x16xbf16, #tpu.memory_space<vmem>>, %arg5: memref<1x16xf32, #tpu.memory_space<vmem>>, %arg6: memref<128x16xf32, #tpu.memory_space<vmem>>) attributes {dimension_semantics = [#tpu.dimension_semantics<parallel>], iteration_bounds = array<i64: 2>, scalar_prefetch = 0 : i64, scratch_operands = 0 : i64, tpu.core_type = #tpu.core_type<tc>, window_params = [{transform_indices = @transform_0, window_bounds = array<i64: 128, 128>}, {pipeline_mode = #tpu.pipeline_mode<synchronous>, transform_indices = @transform_1, window_bounds = array<i64: 128, 256>}, {pipeline_mode = #tpu.pipeline_mode<synchronous>, transform_indices = @transform_2, window_bounds = array<i64: 1, 256>}, {pipeline_mode = #tpu.pipeline_mode<synchronous>, transform_indices = @transform_3, window_bounds = array<i64: 256, 16>}, {pipeline_mode = #tpu.pipeline_mode<synchronous>, transform_indices = @transform_4, window_bounds = array<i64: 1, 16>}, {transform_indices = @transform_5, window_bounds = array<i64: 128, 16>}]} {
    %c0 = arith.constant 0 : index
    %c0_0 = arith.constant 0 : index
    %0 = vector.load %arg3[%c0, %c0_0] : memref<1x256xf32, #tpu.memory_space<vmem>>, vector<1x256xf32>
    %c0_1 = arith.constant 0 : index
    %c0_2 = arith.constant 0 : index
    %1 = vector.load %arg5[%c0_1, %c0_2] : memref<1x16xf32, #tpu.memory_space<vmem>>, vector<1x16xf32>
    %c0_i32 = arith.constant 0 : i32
    %c64_i32 = arith.constant 64 : i32
    %2 = arith.muli %c0_i32, %c64_i32 : i32
    %3 = tpu.assume_multiple %2, 64 : i32
    %4 = arith.index_cast %3 : i32 to index
    %c0_3 = arith.constant 0 : index
    %5 = vector.load %arg1[%4, %c0_3] : memref<128x128xf32, #tpu.memory_space<vmem>>, vector<64x128xf32>
    %6 = arith.truncf %5 : vector<64x128xf32> to vector<64x128xbf16>
    %c0_4 = arith.constant 0 : index
    %c0_5 = arith.constant 0 : index
    %7 = vector.load %arg2[%c0_4, %c0_5] : memref<128x256xbf16, #tpu.memory_space<vmem>>, vector<128x256xbf16>
    %cst = arith.constant dense<0.000000e+00> : vector<64x256xf32>
    %8 = tpu.matmul %6, %7, %cst {dimension_numbers = #tpu.dot_dimension_numbers<[1], [0], [0], [1], [0, 0, 1, 1], [], []>} : vector<64x128xbf16>, vector<128x256xbf16>, vector<64x256xf32> -> vector<64x256xf32>
    %9 = vector.broadcast %0 : vector<1x256xf32> to vector<64x256xf32>
    %10 = arith.addf %8, %9 : vector<64x256xf32>
    %cst_6 = arith.constant 0.000000e+00 : f32
    %11 = vector.broadcast %cst_6 : f32 to vector<64x256xf32>
    %12 = arith.maximumf %10, %11 : vector<64x256xf32>
    %13 = arith.truncf %12 : vector<64x256xf32> to vector<64x256xbf16>
    %c0_7 = arith.constant 0 : index
    %c0_8 = arith.constant 0 : index
    %14 = vector.load %arg4[%c0_7, %c0_8] : memref<256x16xbf16, #tpu.memory_space<vmem>>, vector<256x16xbf16>
    %cst_9 = arith.constant dense<0.000000e+00> : vector<64x16xf32>
    %15 = tpu.matmul %13, %14, %cst_9 {dimension_numbers = #tpu.dot_dimension_numbers<[1], [0], [0], [1], [0, 0, 1, 1], [], []>} : vector<64x256xbf16>, vector<256x16xbf16>, vector<64x16xf32> -> vector<64x16xf32>
    %16 = vector.broadcast %1 : vector<1x16xf32> to vector<64x16xf32>
    %17 = arith.addf %15, %16 : vector<64x16xf32>
    %18 = arith.index_cast %3 : i32 to index
    %c0_10 = arith.constant 0 : index
    %19 = vector.load %arg6[%18, %c0_10] : memref<128x16xf32, #tpu.memory_space<vmem>>, vector<64x16xf32>
    tpu.vector_store %arg6[%18, %c0_10], %17 {strides = array<i32>} : memref<128x16xf32, #tpu.memory_space<vmem>>, vector<64x16xf32>,
    %c1_i32 = arith.constant 1 : i32
    %c64_i32_11 = arith.constant 64 : i32
    %20 = arith.muli %c1_i32, %c64_i32_11 : i32
    %21 = tpu.assume_multiple %20, 64 : i32
    %22 = arith.index_cast %21 : i32 to index
    %c0_12 = arith.constant 0 : index
    %23 = vector.load %arg1[%22, %c0_12] : memref<128x128xf32, #tpu.memory_space<vmem>>, vector<64x128xf32>
    %24 = arith.truncf %23 : vector<64x128xf32> to vector<64x128xbf16>
    %c0_13 = arith.constant 0 : index
    %c0_14 = arith.constant 0 : index
    %25 = vector.load %arg2[%c0_13, %c0_14] : memref<128x256xbf16, #tpu.memory_space<vmem>>, vector<128x256xbf16>
    %cst_15 = arith.constant dense<0.000000e+00> : vector<64x256xf32>
    %26 = tpu.matmul %24, %25, %cst_15 {dimension_numbers = #tpu.dot_dimension_numbers<[1], [0], [0], [1], [0, 0, 1, 1], [], []>} : vector<64x128xbf16>, vector<128x256xbf16>, vector<64x256xf32> -> vector<64x256xf32>
    %27 = vector.broadcast %0 : vector<1x256xf32> to vector<64x256xf32>
    %28 = arith.addf %26, %27 : vector<64x256xf32>
    %cst_16 = arith.constant 0.000000e+00 : f32
    %29 = vector.broadcast %cst_16 : f32 to vector<64x256xf32>
    %30 = arith.maximumf %28, %29 : vector<64x256xf32>
    %31 = arith.truncf %30 : vector<64x256xf32> to vector<64x256xbf16>
    %c0_17 = arith.constant 0 : index
    %c0_18 = arith.constant 0 : index
    %32 = vector.load %arg4[%c0_17, %c0_18] : memref<256x16xbf16, #tpu.memory_space<vmem>>, vector<256x16xbf16>
    %cst_19 = arith.constant dense<0.000000e+00> : vector<64x16xf32>
    %33 = tpu.matmul %31, %32, %cst_19 {dimension_numbers = #tpu.dot_dimension_numbers<[1], [0], [0], [1], [0, 0, 1, 1], [], []>} : vector<64x256xbf16>, vector<256x16xbf16>, vector<64x16xf32> -> vector<64x16xf32>
    %34 = vector.broadcast %1 : vector<1x16xf32> to vector<64x16xf32>
    %35 = arith.addf %33, %34 : vector<64x16xf32>
    %36 = arith.index_cast %21 : i32 to index
    %c0_20 = arith.constant 0 : index
    %37 = vector.load %arg6[%36, %c0_20] : memref<128x16xf32, #tpu.memory_space<vmem>>, vector<64x16xf32>
    tpu.vector_store %arg6[%36, %c0_20], %35 {strides = array<i32>} : memref<128x16xf32, #tpu.memory_space<vmem>>, vector<64x16xf32>,
    %c2_i32 = arith.constant 2 : i32
    return
  }
  func.func @transform_0(%arg0: i32) -> (i32, i32) {
    %c0_i32 = arith.constant 0 : i32
    %c0_i32_0 = arith.constant 0 : i32
    return %arg0, %c0_i32 : i32, i32
  }
  func.func @transform_1(%arg0: i32) -> (i32, i32) {
    %c0_i32 = arith.constant 0 : i32
    %c0_i32_0 = arith.constant 0 : i32
    %c0_i32_1 = arith.constant 0 : i32
    return %c0_i32, %c0_i32_0 : i32, i32
  }
  func.func @transform_2(%arg0: i32) -> (i32, i32) {
    %c0_i32 = arith.constant 0 : i32
    %c0_i32_0 = arith.constant 0 : i32
    %c0_i32_1 = arith.constant 0 : i32
    return %c0_i32, %c0_i32_0 : i32, i32
  }
  func.func @transform_3(%arg0: i32) -> (i32, i32) {
    %c0_i32 = arith.constant 0 : i32
    %c0_i32_0 = arith.constant 0 : i32
    %c0_i32_1 = arith.constant 0 : i32
    return %c0_i32, %c0_i32_0 : i32, i32
  }
  func.func @transform_4(%arg0: i32) -> (i32, i32) {
    %c0_i32 = arith.constant 0 : i32
    %c0_i32_0 = arith.constant 0 : i32
    %c0_i32_1 = arith.constant 0 : i32
    return %c0_i32, %c0_i32_0 : i32, i32
  }
  func.func @transform_5(%arg0: i32) -> (i32, i32) {
    %c0_i32 = arith.constant 0 : i32
    %c0_i32_0 = arith.constant 0 : i32
    return %arg0, %c0_i32 : i32, i32
  }
}

</mosaic_0001>

<bundles_post_ra>
// kernel: nerf_mlp_forward.1
= control target key start
LH: loop header
LB: loop body
LE: loop exit
PB: predicated region body
PF: predicated region fallthrough
CT: control target
= control target key end

     0   :  { %s1395_s18 = smov 0   ;;  %s1715_s0 = inlined_call_operand.vmem [shape: f32[256,128], index: 0, kind: input, shape index: {}]   ;;  %s1716_s1 = inlined_call_operand.vmem [shape: bf16[128,256], index: 1, kind: input, shape index: {}]   ;;  %s1717_s2 = inlined_call_operand.vmem [shape: f32[1,256], index: 2, kind: input, shape index: {}]   ;;  %s1718_s3 = inlined_call_operand.vmem [shape: bf16[256,16], index: 3, kind: input, shape index: {}]   ;;  %s1719_s4 = inlined_call_operand.vmem [shape: f32[1,16], index: 4, kind: input, shape index: {}]   ;;  %s1720_s5 = inlined_call_operand.vmem [shape: f32[256,16], index: 5, kind: output, shape index: {}]  }
   0x1 LB: > { %s1119_s19 = sadd.s32 4294967295, %s1362_s18   ;;  %p1123_p0 = scmp.ge.s32.totalorder %s1362_s18, 1  ;;  %s1362_s18 = sphi %s1395_s18, %s15_s18  }
   0x2   : > { %p188_p1 = scmp.lt.s32.totalorder %s1362_s18, 3 }
   0x4   : > { %p189_p2 = pnand %p1123_p0, %p188_p1 }
   0x5   : > { %v1300_v0 = vld [vmem:[%s1716_s1 + $0x4] ss:$8 sps:$4 sm:$0xff] (!%p189_p2)   ;;  %v1409_v1 = vld [vmem:[%s1716_s1] ss:$8 sps:$4 sm:$0xff] (!%p189_p2)   ;;  %v1364_v2 = vmov (!%p189_p2), 0   ;;  %s1124_s9 = sshll.u32 (!%p189_p2), %s1119_s19, 4  ;;  %v260_v58 = vlaneseq (!%p189_p2) }
   0x6   : > { %192 = sbr.rel (%p189_p2) target bundleno = 536 (0x218), region = 40  ;;  %382 = vmatprep.mubr.bf16.mxu0 (!%p189_p2), %v1364_v2  ;;  %350 = vmatprep.subr.bf16.mxu0 (!%p189_p2), %v1300_v0  ;;  %v1303_v3 = vld [vmem:[%s1716_s1 + $0x14] ss:$8 sps:$4 sm:$0xff] (!%p189_p2)   ;;  %v1419_v4 = vld [vmem:[%s1716_s1 + $0x10] ss:$8 sps:$4 sm:$0xff] (!%p189_p2)   ;;  %p217_p3 = scmp.lt.s32.totalorder (!%p189_p2), %s1124_s9, 31 }
   0x7   : > { %351 = vmatpush1.bf16.msra.mxu0 (!%p189_p2), %v1409_v1  ;;  %v1424_v5 = vld [vmem:[%s1716_s1 + $0x24] ss:$8 sps:$4 sm:$0xff] (!%p189_p2)   ;;  %v1430_v6 = vld [vmem:[%s1716_s1 + $0x20] ss:$8 sps:$4 sm:$0xff] (!%p189_p2)   ;;  %v1436_v7 = vld [vmem:[%s1716_s1 + $0x34] ss:$8 sps:$4 sm:$0xff] (!%p189_p2)  }
   0x8   : > { %352 = vmatprep.subr.bf16.mxu0 (!%p189_p2), %v1303_v3  ;;  %v1442_v8 = vld [vmem:[%s1716_s1 + $0x30] ss:$8 sps:$4 sm:$0xff] (!%p189_p2)   ;;  %v1312_v9 = vld [vmem:[%s1716_s1 + $0x44] ss:$8 sps:$4 sm:$0xff] (!%p189_p2)   ;;  %v1314_v10 = vld [vmem:[%s1716_s1 + $0x40] ss:$8 sps:$4 sm:$0xff] (!%p189_p2)  }
   0x9   : > { %v1455_v11 = vld [vmem:[%s1716_s1 + $0x54] ss:$8 sps:$4 sm:$0xff] (!%p189_p2)   ;;  %v1324_v12 = vld [vmem:[%s1718_s3 + $0x40] sm:$0xff] (!%p189_p2)   ;;  %v1465_v13 = vld [vmem:[%s1716_s1 + $0x50] ss:$8 sps:$4 sm:$0xff] (!%p189_p2)   ;;  %v261_v59 = vshrl.u32 (!%p189_p2), %v260_v58, 7 }
   0xa   : > { %v1325_v14 = vld [vmem:[%s1718_s3] sm:$0xff] (!%p189_p2)   ;;  %1211 = vmatprep.subr.bf16.mxu1 (!%p189_p2), %v1324_v12  ;;  %v1326_v16 = vld [vmem:[%s1718_s3 + $0x48] sm:$0xff] (!%p189_p2)   ;;  %v1328_v18 = vld [vmem:[%s1718_s3 + $0x50] sm:$0xff] (!%p189_p2)   ;;  %vm646_vm0 = vcmask (!%p189_p2), 130048  }
   0xb   : > { %353 = vmatpush1.bf16.msra.mxu0 (!%p189_p2), %v1419_v4  ;;  %v1318_v15 = vld [vmem:[%s1716_s1 + $0x64] ss:$8 sps:$4 sm:$0xff] (!%p189_p2)   ;;  %1212 = vmatpush3.bf16.msra.mxu1 (!%p189_p2), %v1325_v14  ;;  %v1320_v19 = vld [vmem:[%s1716_s1 + $0x60] ss:$8 sps:$4 sm:$0xff] (!%p189_p2)   ;;  %v1321_v20 = vld [vmem:[%s1716_s1 + $0x74] ss:$8 sps:$4 sm:$0xff] (!%p189_p2)  }
   0xc   : > { %354 = vmatprep.subr.bf16.mxu0 (!%p189_p2), %v1424_v5  ;;  %v1327_v17 = vld [vmem:[%s1718_s3 + $0x8] sm:$0xff] (!%p189_p2)   ;;  %1213 = vmatprep.subr.bf16.mxu1 (!%p189_p2), %v1326_v16  ;;  %v1329_v21 = vld [vmem:[%s1718_s3 + $0x10] sm:$0xff] (!%p189_p2)   ;;  %v1330_v22 = vld [vmem:[%s1718_s3 + $0x58] sm:$0xff] (!%p189_p2)   ;;  %v262_v60 = vsub.s32 (!%p189_p2), 0, %v261_v59  ;;  %v266_v62 = vsub.s32 (!%p189_p2), 1, %v261_v59 }
   0xd   : > { %s1722_s9 = smov (!%p217_p3, %s1124_s9), 31  ;;  %v1323_v23 = vld [vmem:[%s1716_s1 + $0x70] ss:$8 sps:$4 sm:$0xff]   ;;  %v1332_v27 = vld [vmem:[%s1718_s3 + $0x60] sm:$0xff]   ;;  %v1334_v30 = vld [vmem:[%s1718_s3 + $0x68] sm:$0xff]  }
   0xe   : > { %s1125_s29 = sshll.u32 %s1722_s9, 3  ;;  %v1331_v26 = vld [vmem:[%s1718_s3 + $0x18] sm:$0xff]   ;;  %v1333_v29 = vld [vmem:[%s1718_s3 + $0x20] sm:$0xff]   ;;  %v1335_v52 = vld [vmem:[%s1718_s3 + $0x28] sm:$0xff]  }
   0xf   : > { %355 = vmatpush1.bf16.msra.mxu0 %v1430_v6  ;;  %s1495_s16 = scalar_lea.vmem %s1715_s0, %s1125_s29  ;;  %1214 = vmatpush3.bf16.msra.mxu1 %v1327_v17  ;;  %v1336_v53 = vld [vmem:[%s1718_s3 + $0x70] sm:$0xff]   ;;  %v1338_v55 = vld [vmem:[%s1718_s3 + $0x78] sm:$0xff]   ;;  %v1340_v57 = vld [vmem:[%s1718_s3 + $0x40] sm:$0xff]   ;;  %s1662_s13 = scalar_lea.vmem %s1720_s5, %s1125_s29 }
  0x10   : > { %356 = vmatprep.subr.bf16.mxu0 %v1436_v7  ;;  %1215 = vmatprep.subr.bf16.mxu1 %v1328_v18  ;;  %v231_v24 = vld [vmem:[%s1495_s16] sm:$0xff]  ;;  %v232_v25 = vld [vmem:[%s1495_s16 + $0x8] sm:$0xff]  ;;  %v233_v31 = vld [vmem:[%s1495_s16 + $0x10] sm:$0xff] }
  0x11   : > { %v239_v28 = vpack.c.bf16 %v232_v25, %v231_v24  ;;  %v234_v32 = vld [vmem:[%s1495_s16 + $0x18] sm:$0xff]  ;;  %v235_v34 = vld [vmem:[%s1495_s16 + $0x20] sm:$0xff]  ;;  %v236_v35 = vld [vmem:[%s1495_s16 + $0x28] sm:$0xff] }
  0x12   : > { %v240_v33 = vpack.c.bf16 %v234_v32, %v233_v31  ;;  %v241_v36 = vpack.c.bf16 %v236_v35, %v235_v34  ;;  %v237_v37 = vld [vmem:[%s1495_s16 + $0x30] sm:$0xff]  ;;  %v238_v38 = vld [vmem:[%s1495_s16 + $0x38] sm:$0xff]  ;;  %v1161_v40 = vld [vmem:[%s1495_s16 + $0x40] sm:$0xff] }
  0x13   : > { %357 = vmatpush1.bf16.msra.mxu0 %v1442_v8  ;;  %1216 = vmatpush3.bf16.msra.mxu1 %v1329_v21  ;;  %v242_v39 = vpack.c.bf16 %v238_v38, %v237_v37  ;;  %v1162_v41 = vld [vmem:[%s1495_s16 + $0x48] sm:$0xff]  ;;  %v1163_v43 = vld [vmem:[%s1495_s16 + $0x50] sm:$0xff]  ;;  %v1164_v44 = vld [vmem:[%s1495_s16 + $0x58] sm:$0xff] }
  0x14   : > { %358 = vmatprep.subr.bf16.mxu0 %v1312_v9  ;;  %1217 = vmatprep.subr.bf16.mxu1 %v1330_v22  ;;  %v664_v42 = vpack.c.bf16 %v1162_v41, %v1161_v40  ;;  %v665_v45 = vpack.c.bf16 %v1164_v44, %v1163_v43  ;;  %v1165_v46 = vld [vmem:[%s1495_s16 + $0x60] sm:$0xff]  ;;  %v1166_v47 = vld [vmem:[%s1495_s16 + $0x68] sm:$0xff]  ;;  %v1167_v49 = vld [vmem:[%s1495_s16 + $0x70] sm:$0xff] }
  0x15   : > { %v666_v48 = vpack.c.bf16 %v1166_v47, %v1165_v46  ;;  %v1168_v50 = vld [vmem:[%s1495_s16 + $0x78] sm:$0xff]  ;;  %v1337_v54 = vld [vmem:[%s1718_s3 + $0x30] sm:$0xff]   ;;  %v229_v61 = vld [vmem:[%s1717_s2] sm:$0x3] }
  0x16   : > { %v667_v51 = vpack.c.bf16 %v1168_v50, %v1167_v49  ;;  %v1339_v56 = vld [vmem:[%s1718_s3 + $0x38] sm:$0xff]   ;;  %v1571_v63 = vrot.slane %v229_v61, %v262_v60  ;;  %v1341_v16 = vld [vmem:[%s1718_s3] sm:$0xff]   ;;  %v1343_v25 = vld [vmem:[%s1718_s3 + $0x8] sm:$0xff]  }
  0x17   : > { %359 = vmatpush1.bf16.msra.mxu0 %v1314_v10  ;;  %1218 = vmatpush3.bf16.msra.mxu1 %v1331_v26  ;;  %v1345_v34 = vld [vmem:[%s1718_s3 + $0x10] sm:$0xff]   ;;  %v1346_v37 = vld [vmem:[%s1718_s3 + $0x58] sm:$0xff]   ;;  %v1348_v46 = vld [vmem:[%s1718_s3 + $0x60] sm:$0xff]  }
  0x18   : > { %360 = vmatprep.subr.bf16.mxu0 %v1455_v11  ;;  %1219 = vmatprep.subr.bf16.mxu1 %v1332_v27  ;;  %v1347_v43 = vld [vmem:[%s1718_s3 + $0x18] sm:$0xff]  }
  0x1b   : > { %361 = vmatpush1.bf16.msra.mxu0 %v1465_v13  ;;  %1220 = vmatpush3.bf16.msra.mxu1 %v1333_v29 }
  0x1c   : > { %362 = vmatprep.subr.bf16.mxu0 %v1318_v15  ;;  %1221 = vmatprep.subr.bf16.mxu1 %v1334_v30 }
  0x1f   : > { %363 = vmatpush1.bf16.msra.mxu0 %v1320_v19  ;;  %1222 = vmatpush3.bf16.msra.mxu1 %v1335_v52  ;;  %v1349_v52 = vld [vmem:[%s1718_s3 + $0x20] sm:$0xff]  }
  0x20   : > { %364 = vmatprep.subr.bf16.mxu0 %v1321_v20  ;;  %1223 = vmatprep.subr.bf16.mxu1 %v1336_v53 }
  0x23   : > { %365 = vmatpush1.bf16.msra.mxu0 %v1323_v23  ;;  %1224 = vmatpush3.bf16.msra.mxu1 %v1337_v54 }
  0x24   : > { %764 = vmatprep.subr.bf16.mxu0 %v1300_v0  ;;  %1225 = vmatprep.subr.bf16.mxu1 %v1338_v55  ;;  %v1573_v0 = vrot.slane %v229_v61, %v266_v62  ;;  %v1350_v55 = vld [vmem:[%s1718_s3 + $0x68] sm:$0xff]  }
  0x25   : > { %v1351_v61 = vld [vmem:[%s1718_s3 + $0x28] sm:$0xff]  }
  0x26   : > { %383 = vmatmul.mubr.bf16.vlgmr.msra.gmra.mrb[0].mxu0 %v239_v28  ;;  %v1344_v28 = vld [vmem:[%s1718_s3 + $0x50] sm:$0xff]  }
  0x27   : > { %765 = vmatpush1.bf16.msra.mxu0 %v1409_v1  ;;  %392 = vmatprep.mubr.bf16.mxu0 %v1364_v2 }
  0x28   : > { %766 = vmatprep.subr.bf16.mxu0 %v1303_v3  ;;  %1226 = vmatpush3.bf16.msra.mxu1 %v1339_v56 }
  0x29   : > { %1251 = vmatprep.subr.bf16.mxu1 %v1340_v57 }
  0x2b   : > { %767 = vmatpush1.bf16.msra.mxu0 %v1419_v4 }
  0x2c   : > { %768 = vmatprep.subr.bf16.mxu0 %v1424_v5 }
  0x2e   : > { %393 = vmatmul.mubr.bf16.gmra.mrb[4].mxu0 %v240_v33 }
  0x2f   : > { %769 = vmatpush1.bf16.msra.mxu0 %v1430_v6  ;;  %402 = vmatprep.mubr.bf16.mxu0 %v1364_v2 }
  0x30   : > { %770 = vmatprep.subr.bf16.mxu0 %v1436_v7 }
  0x33   : > { %771 = vmatpush1.bf16.msra.mxu0 %v1442_v8 }
  0x34   : > { %772 = vmatprep.subr.bf16.mxu0 %v1312_v9 }
  0x36   : > { %403 = vmatmul.mubr.bf16.gmra.mrb[8].mxu0 %v241_v36 }
  0x37   : > { %773 = vmatpush1.bf16.msra.mxu0 %v1314_v10  ;;  %412 = vmatprep.mubr.bf16.mxu0 %v1364_v2 }
  0x38   : > { %774 = vmatprep.subr.bf16.mxu0 %v1455_v11 }
  0x3b   : > { %775 = vmatpush1.bf16.msra.mxu0 %v1465_v13 }
  0x3c   : > { %776 = vmatprep.subr.bf16.mxu0 %v1318_v15 }
  0x3e   : > { %413 = vmatmul.mubr.bf16.gmra.mrb[12].mxu0 %v242_v39 }
  0x3f   : > { %777 = vmatpush1.bf16.msra.mxu0 %v1320_v19  ;;  %796 = vmatprep.mubr.bf16.mxu0 %v1364_v2  ;;  %v1342_v19 = vld [vmem:[%s1718_s3 + $0x48] sm:$0xff]  }
  0x40   : > { %778 = vmatprep.subr.bf16.mxu0 %v1321_v20 }
  0x43   : > { %779 = vmatpush1.bf16.msra.mxu0 %v1323_v23 }
  0x46   : > { %797 = vmatmul.mubr.bf16.vlgmr.msra.gmra.mrb[16].mxu0 %v664_v42 }
  0x47   : > { %806 = vmatprep.mubr.bf16.mxu0 %v1364_v2 }
  0x4e   : > { %807 = vmatmul.mubr.bf16.gmra.mrb[20].mxu0 %v665_v45 }
  0x4f   : > { %816 = vmatprep.mubr.bf16.mxu0 %v1364_v2 }
  0x56   : > { %817 = vmatmul.mubr.bf16.gmra.mrb[24].mxu0 %v666_v48 }
  0x57   : > { %826 = vmatprep.mubr.bf16.mxu0 %v1364_v2 }
  0x5e   : > { %827 = vmatmul.mubr.bf16.gmra.mrb[28].mxu0 %v667_v51 }
  0xf9   : > { %v384_v1 = vpop.f32.mrb[0].mxu0 }
  0xfa   : > { %v385_v2 = vadd.f32 %v384_v1, %v1571_v63  ;;  %v386_v3 = vpop.f32.mrb[1].mxu0 }
  0xfb   : > { %v387_v4 = vadd.f32 %v386_v3, %v1573_v0  ;;  %v388_v5 = vpop.f32.mrb[2].mxu0 }
  0xfc   : > { %v389_v6 = vadd.f32 %v388_v5, %v1571_v63  ;;  %v390_v7 = vpop.f32.mrb[3].mxu0  ;;  %v423_v9 = vmax.f32 %v385_v2, 0.0  ;;  %v1352_v2 = vld [vmem:[%s1718_s3 + $0x70] sm:$0xff]  }
  0xfd   : > { %v391_v8 = vadd.f32 %v390_v7, %v1573_v0  ;;  %v424_v11 = vmax.f32 %v387_v4, 0.0 }
  0xfe   : > { %v425_v10 = vmax.f32 %v389_v6, 0.0 }
  0xff   : > { %v426_v12 = vmax.f32 %v391_v8, 0.0  ;;  %v1353_v8 = vld [vmem:[%s1718_s3 + $0x30] sm:$0xff]  }
 0x100   : > { %v439_v13 = vpack.c.bf16 %v425_v10, %v423_v9 }
 0x101   : > { %v394_v14 = vpop.f32.mrb[4].mxu0  ;;  %v440_v15 = vpack.c.bf16 %v426_v12, %v424_v11  ;;  %v1354_v11 = vld [vmem:[%s1718_s3 + $0x78] sm:$0xff]  }
 0x102   : > { %v395_v17 = vadd.f32 %v394_v14, %v1571_v63  ;;  %v396_v18 = vpop.f32.mrb[5].mxu0 }
 0x103   : > { %v397_v20 = vadd.f32 %v396_v18, %v1573_v0  ;;  %v398_v21 = vpop.f32.mrb[6].mxu0  ;;  %613 = vmatprep.mubr.bf16.mxu1 %v440_v15 }
 0x104   : > { %v399_v22 = vadd.f32 %v398_v21, %v1571_v63  ;;  %v400_v23 = vpop.f32.mrb[7].mxu0  ;;  %614 = vmatmul.mubr.bf16.vlgmr.msra.gmra.mrb[0].mxu1 %v439_v13  ;;  %v427_v26 = vmax.f32 %v395_v17, 0.0  ;;  %v1355_v17 = vld [vmem:[%s1718_s3 + $0x38] sm:$0xff]  }
 0x105   : > { %v401_v24 = vadd.f32 %v400_v23, %v1573_v0  ;;  %1252 = vmatpush3.bf16.msra.mxu1 %v1341_v16  ;;  %v428_v29 = vmax.f32 %v397_v20, 0.0 }
 0x106   : > { %v429_v27 = vmax.f32 %v399_v22, 0.0  ;;  %1253 = vmatprep.subr.bf16.mxu1 %v1342_v19 }
 0x107   : > { %v430_v30 = vmax.f32 %v401_v24, 0.0 }
 0x108   : > { %v441_v31 = vpack.c.bf16 %v429_v27, %v427_v26 }
 0x109   : > { %v442_v32 = vpack.c.bf16 %v430_v30, %v428_v29  ;;  %v404_v33 = vpop.f32.mrb[8].mxu0  ;;  %1254 = vmatpush3.bf16.msra.mxu1 %v1343_v25 }
 0x10a   : > { %v405_v35 = vadd.f32 %v404_v33, %v1571_v63  ;;  %v406_v36 = vpop.f32.mrb[9].mxu0  ;;  %1255 = vmatprep.subr.bf16.mxu1 %v1344_v28 }
 0x10b   : > { %v407_v38 = vadd.f32 %v406_v36, %v1573_v0  ;;  %v408_v39 = vpop.f32.mrb[10].mxu0  ;;  %621 = vmatprep.mubr.bf16.mxu1 %v442_v32 }
 0x10c   : > { %v409_v40 = vadd.f32 %v408_v39, %v1571_v63  ;;  %v410_v41 = vpop.f32.mrb[11].mxu0  ;;  %622 = vmatmul.mubr.bf16.gmra.mrb[4].mxu1 %v441_v31  ;;  %v431_v44 = vmax.f32 %v405_v35, 0.0 }
 0x10d   : > { %v411_v42 = vadd.f32 %v410_v41, %v1573_v0  ;;  %1256 = vmatpush3.bf16.msra.mxu1 %v1345_v34  ;;  %v432_v47 = vmax.f32 %v407_v38, 0.0 }
 0x10e   : > { %v433_v45 = vmax.f32 %v409_v40, 0.0  ;;  %1257 = vmatprep.subr.bf16.mxu1 %v1346_v37 }
 0x10f   : > { %v434_v48 = vmax.f32 %v411_v42, 0.0 }
 0x110   : > { %v443_v49 = vpack.c.bf16 %v433_v45, %v431_v44 }
 0x111   : > { %v444_v50 = vpack.c.bf16 %v434_v48, %v432_v47  ;;  %v414_v51 = vpop.f32.mrb[12].mxu0  ;;  %1258 = vmatpush3.bf16.msra.mxu1 %v1347_v43 }
 0x112   : > { %v415_v53 = vadd.f32 %v414_v51, %v1571_v63  ;;  %v416_v54 = vpop.f32.mrb[13].mxu0  ;;  %1259 = vmatprep.subr.bf16.mxu1 %v1348_v46 }
 0x113   : > { %v417_v56 = vadd.f32 %v416_v54, %v1573_v0  ;;  %v418_v57 = vpop.f32.mrb[14].mxu0  ;;  %629 = vmatprep.mubr.bf16.mxu1 %v444_v50 }
 0x114   : > { %v419_v58 = vadd.f32 %v418_v57, %v1571_v63  ;;  %v420_v59 = vpop.f32.mrb[15].mxu0  ;;  %630 = vmatmul.mubr.bf16.gmra.mrb[8].mxu1 %v443_v49  ;;  %v435_v62 = vmax.f32 %v415_v53, 0.0 }
 0x115   : > { %v421_v60 = vadd.f32 %v420_v59, %v1573_v0  ;;  %1260 = vmatpush3.bf16.msra.mxu1 %v1349_v52  ;;  %v436_v3 = vmax.f32 %v417_v56, 0.0 }
 0x116   : > { %v437_v1 = vmax.f32 %v419_v58, 0.0  ;;  %1261 = vmatprep.subr.bf16.mxu1 %v1350_v55 }
 0x117   : > { %v438_v4 = vmax.f32 %v421_v60, 0.0 }
 0x118   : > { %v445_v5 = vpack.c.bf16 %v437_v1, %v435_v62 }
 0x119   : > { %v446_v6 = vpack.c.bf16 %v438_v4, %v436_v3  ;;  %v798_v7 = vpop.f32.mrb[16].mxu0  ;;  %1262 = vmatpush3.bf16.msra.mxu1 %v1351_v61 }
 0x11a   : > { %v799_v9 = vadd.f32 %v798_v7, %v1571_v63  ;;  %v800_v10 = vpop.f32.mrb[17].mxu0  ;;  %1263 = vmatprep.subr.bf16.mxu1 %v1352_v2 }
 0x11b   : > { %v801_v12 = vadd.f32 %v800_v10, %v1573_v0  ;;  %637 = vmatprep.mubr.bf16.mxu1 %v446_v6  ;;  %v802_v13 = vpop.f32.mrb[18].mxu0 }
 0x11c   : > { %v803_v14 = vadd.f32 %v802_v13, %v1571_v63  ;;  %638 = vmatmul.mubr.bf16.gmra.mrb[12].mxu1 %v445_v5  ;;  %v804_v15 = vpop.f32.mrb[19].mxu0  ;;  %v837_v18 = vmax.f32 %v799_v9, 0.0  ;;  %v1655_v5 = vld [vmem:[%s1719_s4] ss:$0 sm:$0xff] }
 0x11d   : > { %v805_v16 = vadd.f32 %v804_v15, %v1573_v0  ;;  %1264 = vmatpush3.bf16.msra.mxu1 %v1353_v8  ;;  %v838_v20 = vmax.f32 %v801_v12, 0.0 }
 0x11e   : > { %v839_v19 = vmax.f32 %v803_v14, 0.0  ;;  %1265 = vmatprep.subr.bf16.mxu1 %v1354_v11 }
 0x11f   : > { %v840_v21 = vmax.f32 %v805_v16, 0.0 }
 0x120   : > { %v853_v22 = vpack.c.bf16 %v839_v19, %v837_v18 }
 0x121   : > { %v854_v23 = vpack.c.bf16 %v840_v21, %v838_v20  ;;  %v808_v24 = vpop.f32.mrb[20].mxu0  ;;  %1266 = vmatpush3.bf16.msra.mxu1 %v1355_v17 }
 0x122   : > { %v809_v25 = vadd.f32 %v808_v24, %v1571_v63  ;;  %v810_v26 = vpop.f32.mrb[21].mxu0 }
 0x123   : > { %v811_v27 = vadd.f32 %v810_v26, %v1573_v0  ;;  %v812_v28 = vpop.f32.mrb[22].mxu0  ;;  %1021 = vmatprep.mubr.bf16.mxu1 %v854_v23 }
 0x124   : > { %v813_v29 = vadd.f32 %v812_v28, %v1571_v63  ;;  %v814_v30 = vpop.f32.mrb[23].mxu0  ;;  %1022 = vmatmul.mubr.bf16.vlgmr.msra.gmra.mrb[16].mxu1 %v853_v22  ;;  %v841_v32 = vmax.f32 %v809_v25, 0.0 }
 0x125   : > { %v815_v31 = vadd.f32 %v814_v30, %v1573_v0  ;;  %v842_v34 = vmax.f32 %v811_v27, 0.0 }
 0x126   : > { %v843_v33 = vmax.f32 %v813_v29, 0.0 }
 0x127   : > { %v844_v35 = vmax.f32 %v815_v31, 0.0 }
 0x128   : > { %v855_v36 = vpack.c.bf16 %v843_v33, %v841_v32 }
 0x129   : > { %v856_v37 = vpack.c.bf16 %v844_v35, %v842_v34  ;;  %v818_v38 = vpop.f32.mrb[24].mxu0 }
 0x12a   : > { %v819_v39 = vadd.f32 %v818_v38, %v1571_v63  ;;  %v820_v40 = vpop.f32.mrb[25].mxu0 }
 0x12b   : > { %v821_v41 = vadd.f32 %v820_v40, %v1573_v0  ;;  %v822_v42 = vpop.f32.mrb[26].mxu0  ;;  %1029 = vmatprep.mubr.bf16.mxu1 %v856_v37 }
 0x12c   : > { %v823_v43 = vadd.f32 %v822_v42, %v1571_v63  ;;  %v824_v44 = vpop.f32.mrb[27].mxu0  ;;  %1030 = vmatmul.mubr.bf16.gmra.mrb[20].mxu1 %v855_v36  ;;  %v845_v46 = vmax.f32 %v819_v39, 0.0 }
 0x12d   : > { %v825_v45 = vadd.f32 %v824_v44, %v1573_v0  ;;  %v846_v48 = vmax.f32 %v821_v41, 0.0 }
 0x12e   : > { %v847_v47 = vmax.f32 %v823_v43, 0.0 }
 0x12f   : > { %v848_v49 = vmax.f32 %v825_v45, 0.0 }
 0x130   : > { %v857_v50 = vpack.c.bf16 %v847_v47, %v845_v46 }
 0x131   : > { %v858_v51 = vpack.c.bf16 %v848_v49, %v846_v48  ;;  %v828_v52 = vpop.f32.mrb[28].mxu0 }
 0x132   : > { %v829_v53 = vadd.f32 %v828_v52, %v1571_v63  ;;  %v830_v54 = vpop.f32.mrb[29].mxu0 }
 0x133   : > { %v831_v55 = vadd.f32 %v830_v54, %v1573_v0  ;;  %v832_v56 = vpop.f32.mrb[30].mxu0  ;;  %1037 = vmatprep.mubr.bf16.mxu1 %v858_v51 }
 0x134   : > { %v833_v57 = vadd.f32 %v832_v56, %v1571_v63  ;;  %v834_v58 = vpop.f32.mrb[31].mxu0  ;;  %1038 = vmatmul.mubr.bf16.gmra.mrb[24].mxu1 %v857_v50  ;;  %v849_v60 = vmax.f32 %v829_v53, 0.0 }
 0x135   : > { %v835_v59 = vadd.f32 %v834_v58, %v1573_v0  ;;  %v850_v62 = vmax.f32 %v831_v55, 0.0 }
 0x136   : > { %v851_v61 = vmax.f32 %v833_v57, 0.0 }
 0x137   : > { %v852_v1 = vmax.f32 %v835_v59, 0.0 }
 0x138   : > { %v859_v2 = vpack.c.bf16 %v851_v61, %v849_v60 }
 0x139   : > { %v860_v3 = vpack.c.bf16 %v852_v1, %v850_v62 }
 0x13b   : > { %1045 = vmatprep.mubr.bf16.mxu1 %v860_v3 }
 0x13c   : > { %1046 = vmatmul.mubr.bf16.gmra.mrb[28].mxu1 %v859_v2 }
 0x1d7   : > { %v1227_v4 = vpop.f32.mrb[0].mxu1 }
 0x1d8   : > { %v1228_v63 = vpop.f32.mrb[1].mxu1 }
 0x1d9   : > { %v1229_v6 = vadd.f32 %v1228_v63, %v1227_v4  ;;  %v1230_v7 = vpop.f32.mrb[2].mxu1 }
 0x1da   : > { %v1231_v0 = vpop.f32.mrb[3].mxu1 }
 0x1db   : > { %v616_v8 = vadd.f32 %v1229_v6, %v1655_v5  ;;  %v1232_v9 = vadd.f32 %v1231_v0, %v1230_v7 }
 0x1dd   : > { %647 = vst.msk [vmem:[%s1662_s13] sm:$0xff] %vm646_vm0, %v616_v8  ;;  %v619_v10 = vadd.f32 %v1232_v9, %v1655_v5 }
 0x1df   : > { %648 = vst.msk [vmem:[%s1662_s13 + $0x8] sm:$0xff] %vm646_vm0, %v619_v10  ;;  %v1233_v11 = vpop.f32.mrb[4].mxu1 }
 0x1e0   : > { %v1234_v12 = vpop.f32.mrb[5].mxu1 }
 0x1e1   : > { %v1235_v13 = vadd.f32 %v1234_v12, %v1233_v11  ;;  %v1236_v14 = vpop.f32.mrb[6].mxu1 }
 0x1e2   : > { %v1237_v15 = vpop.f32.mrb[7].mxu1 }
 0x1e3   : > { %v624_v16 = vadd.f32 %v1235_v13, %v1655_v5  ;;  %v1238_v17 = vadd.f32 %v1237_v15, %v1236_v14 }
 0x1e5   : > { %649 = vst.msk [vmem:[%s1662_s13 + $0x10] sm:$0xff] %vm646_vm0, %v624_v16  ;;  %v627_v18 = vadd.f32 %v1238_v17, %v1655_v5 }
 0x1e7   : > { %650 = vst.msk [vmem:[%s1662_s13 + $0x18] sm:$0xff] %vm646_vm0, %v627_v18  ;;  %v1239_v19 = vpop.f32.mrb[8].mxu1 }
 0x1e8   : > { %v1240_v20 = vpop.f32.mrb[9].mxu1 }
 0x1e9   : > { %v1241_v21 = vadd.f32 %v1240_v20, %v1239_v19  ;;  %v1242_v22 = vpop.f32.mrb[10].mxu1 }
 0x1ea   : > { %v1243_v23 = vpop.f32.mrb[11].mxu1 }
 0x1eb   : > { %v632_v24 = vadd.f32 %v1241_v21, %v1655_v5  ;;  %v1244_v25 = vadd.f32 %v1243_v23, %v1242_v22 }
 0x1ed   : > { %651 = vst.msk [vmem:[%s1662_s13 + $0x20] sm:$0xff] %vm646_vm0, %v632_v24  ;;  %v635_v26 = vadd.f32 %v1244_v25, %v1655_v5 }
 0x1ef   : > { %652 = vst.msk [vmem:[%s1662_s13 + $0x28] sm:$0xff] %vm646_vm0, %v635_v26  ;;  %v1245_v27 = vpop.f32.mrb[12].mxu1 }
 0x1f0   : > { %v1246_v28 = vpop.f32.mrb[13].mxu1 }
 0x1f1   : > { %v1247_v29 = vadd.f32 %v1246_v28, %v1245_v27  ;;  %v1248_v30 = vpop.f32.mrb[14].mxu1 }
 0x1f2   : > { %v1249_v31 = vpop.f32.mrb[15].mxu1 }
 0x1f3   : > { %v640_v32 = vadd.f32 %v1247_v29, %v1655_v5  ;;  %v1250_v33 = vadd.f32 %v1249_v31, %v1248_v30 }
 0x1f5   : > { %653 = vst.msk [vmem:[%s1662_s13 + $0x30] sm:$0xff] %vm646_vm0, %v640_v32  ;;  %v643_v34 = vadd.f32 %v1250_v33, %v1655_v5 }
 0x1f7   : > { %654 = vst.msk [vmem:[%s1662_s13 + $0x38] sm:$0xff] %vm646_vm0, %v643_v34  ;;  %v1267_v35 = vpop.f32.mrb[16].mxu1 }
 0x1f8   : > { %v1268_v36 = vpop.f32.mrb[17].mxu1 }
 0x1f9   : > { %v1269_v37 = vadd.f32 %v1268_v36, %v1267_v35  ;;  %v1270_v38 = vpop.f32.mrb[18].mxu1 }
 0x1fa   : > { %v1271_v39 = vpop.f32.mrb[19].mxu1 }
 0x1fb   : > { %v1024_v40 = vadd.f32 %v1269_v37, %v1655_v5  ;;  %v1272_v41 = vadd.f32 %v1271_v39, %v1270_v38 }
 0x1fd   : > { %1201 = vst.msk [vmem:[%s1662_s13 + $0x40] sm:$0xff] %vm646_vm0, %v1024_v40  ;;  %v1027_v42 = vadd.f32 %v1272_v41, %v1655_v5 }
 0x1ff   : > { %1202 = vst.msk [vmem:[%s1662_s13 + $0x48] sm:$0xff] %vm646_vm0, %v1027_v42  ;;  %v1273_v43 = vpop.f32.mrb[20].mxu1 }
 0x200   : > { %v1274_v44 = vpop.f32.mrb[21].mxu1 }
 0x201   : > { %v1275_v45 = vadd.f32 %v1274_v44, %v1273_v43  ;;  %v1276_v46 = vpop.f32.mrb[22].mxu1 }
 0x202   : > { %v1277_v47 = vpop.f32.mrb[23].mxu1 }
 0x203   : > { %v1032_v48 = vadd.f32 %v1275_v45, %v1655_v5  ;;  %v1278_v49 = vadd.f32 %v1277_v47, %v1276_v46 }
 0x205   : > { %1203 = vst.msk [vmem:[%s1662_s13 + $0x50] sm:$0xff] %vm646_vm0, %v1032_v48  ;;  %v1035_v50 = vadd.f32 %v1278_v49, %v1655_v5 }
 0x207   : > { %1204 = vst.msk [vmem:[%s1662_s13 + $0x58] sm:$0xff] %vm646_vm0, %v1035_v50  ;;  %v1279_v51 = vpop.f32.mrb[24].mxu1 }
 0x208   : > { %v1280_v52 = vpop.f32.mrb[25].mxu1 }
 0x209   : > { %v1281_v53 = vadd.f32 %v1280_v52, %v1279_v51  ;;  %v1282_v54 = vpop.f32.mrb[26].mxu1 }
 0x20a   : > { %v1283_v55 = vpop.f32.mrb[27].mxu1 }
 0x20b   : > { %v1040_v56 = vadd.f32 %v1281_v53, %v1655_v5  ;;  %v1284_v57 = vadd.f32 %v1283_v55, %v1282_v54 }
 0x20d   : > { %1205 = vst.msk [vmem:[%s1662_s13 + $0x60] sm:$0xff] %vm646_vm0, %v1040_v56  ;;  %v1043_v58 = vadd.f32 %v1284_v57, %v1655_v5 }
 0x20f   : > { %1206 = vst.msk [vmem:[%s1662_s13 + $0x68] sm:$0xff] %vm646_vm0, %v1043_v58  ;;  %v1285_v59 = vpop.f32.mrb[28].mxu1 }
 0x210   : > { %v1286_v60 = vpop.f32.mrb[29].mxu1 }
 0x211   : > { %v1287_v61 = vadd.f32 %v1286_v60, %v1285_v59  ;;  %v1288_v62 = vpop.f32.mrb[30].mxu1 }
 0x212   : > { %v1289_v1 = vpop.f32.mrb[31].mxu1 }
 0x213   : > { %v1048_v2 = vadd.f32 %v1287_v61, %v1655_v5  ;;  %v1290_v3 = vadd.f32 %v1289_v1, %v1288_v62 }
 0x215   : > { %1207 = vst.msk [vmem:[%s1662_s13 + $0x70] sm:$0xff] %vm646_vm0, %v1048_v2  ;;  %v1051_v4 = vadd.f32 %v1290_v3, %v1655_v5 }
 0x217   : > { %1208 = vst.msk [vmem:[%s1662_s13 + $0x78] sm:$0xff] %vm646_vm0, %v1051_v4 }
 0x218 PF: > { %s15_s18 = sadd.s32 1, %s1362_s18  }
 0x219   : > { %p12_p4 = scmp.ge.s32.totalorder %s15_s18, 4  }
 0x21b   :  { %14 = sbr.rel (!%p12_p4) target bundleno = 1 (0x1), region = 72 }

</bundles_post_ra>
